<compile_context>
chip_gen: v7x
topology: tpu7x:2x2x1
jax: 0.10.0
libtpu: 0.0.40
codegen_flags: <defaults>
</compile_context>

<pallas_src>
import jax
import jax.numpy as jnp
from jax.experimental import pallas as pl
from jax.experimental.pallas import tpu as pltpu


def _round_up(x: int, m: int) -> int:
    return ((x + m - 1) // m) * m


def cross_entropy(logits, target, *, max_tile_bytes=4 << 20):
    """CrossEntropyLoss(reduction='mean') for 2-D logits [N, C] and int targets [N]."""
    n, c = logits.shape
    itemsize = jnp.dtype(logits.dtype).itemsize
    row_bytes = max(1, c * itemsize)

    # Largest row tile (multiple of 8) whose logits slab fits max_tile_bytes per buffer,
    # capped so large batches still give >= ~4 grid steps (v7x megacore split).
    rows_fit = max(8, (max_tile_bytes // row_bytes) // 8 * 8)
    rows_cap = max(8, _round_up(pl.cdiv(n, 4), 8))
    tm = int(min(rows_fit, rows_cap))
    num_tiles = pl.cdiv(n, tm)

    tile_bytes = tm * row_bytes
    vmem_limit = int(min(48 << 20, max(32 << 20, 2 * tile_bytes + (4 << 20))))

    target2d = target.astype(jnp.int32).reshape(n, 1)

    def kernel(logits_ref, target_ref, out_ref):
        x = logits_ref[...]                                 # (TM, C) native dtype
        t = target_ref[...]                                 # (TM, 1) int32
        tm_, c_ = x.shape

        # Target-logit gather via one-hot select on native-dtype data (exact: one nonzero/row).
        cls_row = jax.lax.broadcasted_iota(jnp.int32, (1, c_), 1)      # (1, C)
        onehot = cls_row == t                                          # (TM, C) bool
        tgt = jnp.sum(jnp.where(onehot, x, jnp.zeros((), x.dtype)),
                      axis=-1, keepdims=True).astype(jnp.float32)      # (TM, 1)

        # Numerically stable logsumexp in f32 (cast in-register; DMA paid in native dtype).
        xf = x.astype(jnp.float32)
        m = jnp.max(xf, axis=-1, keepdims=True)                        # (TM, 1)
        sum_exp = jnp.sum(jnp.exp(xf - m), axis=-1, keepdims=True)     # (TM, 1)

        nll = jnp.log(sum_exp) + m - tgt                               # (TM, 1)

        # Mask rows past the true batch size (clipped edge block contains garbage rows);
        # jnp.where blocks NaN/Inf from those rows before the cross-row sum.
        row_ids = pl.program_id(0) * tm_ + jax.lax.broadcasted_iota(jnp.int32, (tm_, 1), 0)
        valid = row_ids < n
        partial = jnp.sum(jnp.where(valid, nll, 0.0))                  # scalar f32

        # Dense (1, 8, 128) store of the per-tile partial sum (no masked vst).
        out_ref[...] = jnp.full((1, 8, 128), partial, dtype=jnp.float32)

    partials = pl.pallas_call(
        kernel,
        out_shape=jax.ShapeDtypeStruct((num_tiles, 8, 128), jnp.float32),
        grid_spec=pltpu.PrefetchScalarGridSpec(
            num_scalar_prefetch=0,
            grid=(num_tiles,),
            in_specs=[
                pl.BlockSpec((tm, c), lambda i: (i, 0)),   # logits batch tile (native dtype)
                pl.BlockSpec((tm, 1), lambda i: (i, 0)),   # targets batch tile
            ],
            out_specs=pl.BlockSpec((1, 8, 128), lambda i: (i, 0, 0)),
        ),
        compiler_params=pltpu.CompilerParams(
            dimension_semantics=("parallel",),
            vmem_limit_bytes=vmem_limit,
        ),
    )(logits, target2d)

    # Mean over the *true* batch size; padded/garbage rows were masked in-kernel.
    return jnp.sum(partials[:, 0, 0]) / n


def _reference(logits, target):
    logits = logits.astype(jnp.float32)
    return jnp.mean(
        jax.nn.logsumexp(logits, axis=-1)
        - jnp.take_along_axis(logits, target[:, None].astype(jnp.int32), axis=-1)[:, 0]
    )


if __name__ == "__main__":
    key = jax.random.PRNGKey(0)
    k1, k2, k3, k4, k5, k6 = jax.random.split(key, 6)

    # Case 1: small, tile-aligned batch (batch=8, classes=32), float32 logits.
    N, C = 8, 32
    logits = jax.random.normal(k1, (N, C), dtype=jnp.float32)
    target = jax.random.randint(k2, (N,), 0, C, dtype=jnp.int32)
    loss = cross_entropy(logits, target)
    jax.block_until_ready(loss)
    ref = _reference(logits, target)
    assert jnp.allclose(loss, ref, atol=1e-5, rtol=1e-5), (loss, ref)

    # Case 2: non-tile-aligned batch (exercises clipped edge block + in-kernel mask), batch=13.
    N2, C2 = 13, 32
    logits2 = jax.random.normal(k3, (N2, C2), dtype=jnp.float32)
    target2 = jax.random.randint(k4, (N2,), 0, C2, dtype=jnp.int32)
    loss2 = cross_entropy(logits2, target2)
    jax.block_until_ready(loss2)
    ref2 = _reference(logits2, target2)
    assert jnp.allclose(loss2, ref2, atol=1e-5, rtol=1e-5), (loss2, ref2)

    # Case 3: bf16 logits (native-dtype DMA, in-register f32 math), batch=16.
    N3, C3 = 16, 64
    logits3 = jax.random.normal(k5, (N3, C3), dtype=jnp.float32).astype(jnp.bfloat16)
    target3 = jax.random.randint(k6, (N3,), 0, C3, dtype=jnp.int32)
    loss3 = cross_entropy(logits3, target3)
    jax.block_until_ready(loss3)
    ref3 = _reference(logits3, target3)
    assert jnp.allclose(loss3, ref3, atol=1e-3, rtol=1e-3), (loss3, ref3)

    print("KERNEL_OK")
</pallas_src>

<mosaic_0001>
module attributes {stable_mosaic.version = 11 : i64} {
  func.func @kernel(%arg0: i32, %arg1: memref<8x32xf32, #tpu.memory_space<vmem>>, %arg2: memref<8x1xi32, #tpu.memory_space<vmem>>, %arg3: memref<1x8x128xf32, #tpu.memory_space<vmem>>) attributes {dimension_semantics = [#tpu.dimension_semantics<parallel>], iteration_bounds = array<i64: 1>, scalar_prefetch = 0 : i64, scratch_operands = 0 : i64, tpu.core_type = #tpu.core_type<tc>, window_params = [{transform_indices = @transform_0, window_bounds = array<i64: 8, 32>}, {transform_indices = @transform_1, window_bounds = array<i64: 8, 1>}, {transform_indices = @transform_2, window_bounds = array<i64: 1, 8, 128>}]} {
    %c0 = arith.constant 0 : index
    %c0_0 = arith.constant 0 : index
    %0 = vector.load %arg1[%c0, %c0_0] : memref<8x32xf32, #tpu.memory_space<vmem>>, vector<8x32xf32>
    %c0_1 = arith.constant 0 : index
    %c0_2 = arith.constant 0 : index
    %1 = vector.load %arg2[%c0_1, %c0_2] : memref<8x1xi32, #tpu.memory_space<vmem>>, vector<8x1xi32>
    %2 = tpu.iota {dimensions = array<i32: 1>} : vector<1x32xi32>
    %3 = vector.broadcast %2 : vector<1x32xi32> to vector<8x32xi32>
    %4 = vector.broadcast %1 : vector<8x1xi32> to vector<8x32xi32>
    %5 = arith.cmpi eq, %3, %4 : vector<8x32xi32>
    %cst = arith.constant 0.000000e+00 : f32
    %6 = vector.broadcast %cst : f32 to vector<8x32xf32>
    %7 = arith.select %5, %0, %6 : vector<8x32xi1>, vector<8x32xf32>
    %cst_3 = arith.constant dense<0.000000e+00> : vector<8xf32>
    %8 = vector.multi_reduction <add>, %7, %cst_3 [1] : vector<8x32xf32> to vector<8xf32>
    %9 = vector.shape_cast %8 : vector<8xf32> to vector<8x1xf32>
    %cst_4 = arith.constant dense<0xFF800000> : vector<8xf32>
    %10 = vector.multi_reduction <maximumf>, %0, %cst_4 [1] : vector<8x32xf32> to vector<8xf32>
    %11 = vector.shape_cast %10 : vector<8xf32> to vector<8x1xf32>
    %12 = vector.broadcast %11 : vector<8x1xf32> to vector<8x32xf32>
    %13 = arith.subf %0, %12 : vector<8x32xf32>
    %14 = math.exp %13 : vector<8x32xf32>
    %cst_5 = arith.constant dense<0.000000e+00> : vector<8xf32>
    %15 = vector.multi_reduction <add>, %14, %cst_5 [1] : vector<8x32xf32> to vector<8xf32>
    %16 = vector.shape_cast %15 : vector<8xf32> to vector<8x1xf32>
    %17 = math.log %16 : vector<8x1xf32>
    %18 = arith.addf %17, %11 : vector<8x1xf32>
    %19 = arith.subf %18, %9 : vector<8x1xf32>
    %c8_i32 = arith.constant 8 : i32
    %20 = arith.muli %arg0, %c8_i32 : i32
    %21 = tpu.iota {dimensions = array<i32: 0>} : vector<8x1xi32>
    %22 = vector.broadcast %20 : i32 to vector<8x1xi32>
    %23 = arith.addi %22, %21 : vector<8x1xi32>
    %c8_i32_6 = arith.constant 8 : i32
    %24 = vector.broadcast %c8_i32_6 : i32 to vector<8x1xi32>
    %25 = arith.cmpi slt, %23, %24 : vector<8x1xi32>
    %cst_7 = arith.constant 0.000000e+00 : f32
    %26 = vector.broadcast %cst_7 : f32 to vector<8x1xf32>
    %27 = arith.select %25, %19, %26 : vector<8x1xi1>, vector<8x1xf32>
    %28 = vector.shape_cast %27 : vector<8x1xf32> to vector<1x8x1xf32>
    %cst_8 = arith.constant dense<0.000000e+00> : vector<1xf32>
    %29 = vector.multi_reduction <add>, %28, %cst_8 [1, 2] : vector<1x8x1xf32> to vector<1xf32>
    %30 = vector.shape_cast %29 : vector<1xf32> to vector<1x1x1xf32>
    %31 = vector.extract %30[0, 0, 0] : f32 from vector<1x1x1xf32>
    %32 = vector.broadcast %31 : f32 to vector<1x8x128xf32>
    %c0_9 = arith.constant 0 : index
    %c0_10 = arith.constant 0 : index
    %c0_11 = arith.constant 0 : index
    %33 = vector.load %arg3[%c0_9, %c0_10, %c0_11] : memref<1x8x128xf32, #tpu.memory_space<vmem>>, vector<1x8x128xf32>
    tpu.vector_store %arg3[%c0_9, %c0_10, %c0_11], %32 {strides = array<i32>} : memref<1x8x128xf32, #tpu.memory_space<vmem>>, vector<1x8x128xf32>,
    return
  }
  func.func @transform_0(%arg0: i32) -> (i32, i32) {
    %c0_i32 = arith.constant 0 : i32
    %c0_i32_0 = arith.constant 0 : i32
    return %arg0, %c0_i32 : i32, i32
  }
  func.func @transform_1(%arg0: i32) -> (i32, i32) {
    %c0_i32 = arith.constant 0 : i32
    %c0_i32_0 = arith.constant 0 : i32
    return %arg0, %c0_i32 : i32, i32
  }
  func.func @transform_2(%arg0: i32) -> (i32, i32, i32) {
    %c0_i32 = arith.constant 0 : i32
    %c0_i32_0 = arith.constant 0 : i32
    %c0_i32_1 = arith.constant 0 : i32
    return %arg0, %c0_i32, %c0_i32_0 : i32, i32, i32
  }
}

</mosaic_0001>

<bundles_post_ra>
// kernel: tpu_custom_call.1
= control target key start
LH: loop header
LB: loop body
LE: loop exit
PB: predicated region body
PF: predicated region fallthrough
CT: control target
= control target key end

     0   :  { %vm21_vm0 = vcmask 261120   ;;  %s143_s0 = inlined_call_operand.vmem [shape: f32[8,32], index: 0, kind: input, shape index: {}]   ;;  %s144_s1 = inlined_call_operand.vmem [shape: s32[8,1], index: 1, kind: input, shape index: {}]   ;;  %s145_s2 = inlined_call_operand.hbm [shape: f32[1,8,128], index: 2, kind: output, shape index: {}]  }
   0x1   :  { %v12_v0 = vld [vmem:[%s143_s0] sm:$0xff] }
   0x2   :  { %7 = vsyncpa [#allocation3], 0  ;;  %v25_v1 = vsel %vm21_vm0, %v12_v0, -inf  ;;  %v105_v2 = vmov 0   ;;  %v13_v3 = vld [vmem:[%s144_s1] sm:$0xff]  ;;  %v14_v7 = vlaneseq  ;;  %vm45_vm2 = vcmask 7168  }
   0x3   :  { %76 = vset.pattern.permute.xlu0 %v105_v2  ;;  %s106_s0 = smov [#allocation2]  }
   0x4   :  { %26 = vmax.xlane.f32.xlu0 %v25_v1  ;;  %v15_v8 = vand.u32 127, %v14_v7  ;;  %s64_s1 = sshll.u32 %s106_s0, 4  ;;  %s65_s1 = int_to_ptr.vmem [resolvable:$true] %s64_s1 }
   0x5   :  { %s81_s14 = scalar_lea.vmem %s65_s1, 128  ;;  %p86_p1 = scmp.lt.s32.totalorder %s65_s1, %s65_s1 }
   0x6   :  { %p82_p0 = scmp.ne.s32.totalorder %s65_s1, %s81_s14  ;;  %p87_p2 = scmp.lt.s32.totalorder %s81_s14, %s81_s14 }
   0x8   :  { %p88_p3 = por %p87_p2, %p86_p1 }
   0xa   :  { %p89_p4 = pnand %p88_p3, %p82_p0 }
  0x1a   :  { %17 = vperm.xlu0 %76, %v13_v3  }
  0x91   :  { %v27_v4 = vpop.xlane.xlu0 %26 }
  0x92   :  { %v28_v5 = vsub.f32 %v12_v0, %v27_v4 }
  0x94   :  { %v29_v6 = vmul.f32 1.442695, %v28_v5 }
  0x96   :  { %77 = vpow2.f32 %v29_v6 }
  0x99   :  { %v18_v9 = vpop.permute.xlu0 %17 }
  0x9a   :  { %vm19_vm1 = vcmp.eq.s32.totalorder %v15_v8, %v18_v9 }
  0x9b   :  { %v20_v11 = vsel %vm19_vm1, %v12_v0, 0.0 }
  0x9c   :  { %v22_v13 = vsel %vm21_vm0, %v20_v11, 0.0 }
  0xa0   :  { %v78_v10 = vpop.eup %77 }
  0xa1   :  { %v31_v12 = vsel %vm21_vm0, %v78_v10, 0.0 }
  0xa2   :  { %32 = vadd.xlane.f32.xlu1 %v31_v12 }
  0xa6   :  { %23 = vadd.xlane.f32.xlu1 %v22_v13 }
 0x12f   :  { %v33_v14 = vpop.xlane.xlu1 %32 }
 0x130   :  { %79 = vlog2.f32 %v33_v14 }
 0x133   :  { %v24_v17 = vpop.xlane.xlu1 %23 }
 0x13a   :  { %v80_v15 = vpop.eup %79 }
 0x13b   :  { %v35_v16 = vmul.f32 0.6931472, %v80_v15 }
 0x13d   :  { %v36_v18 = vadd.f32 %v35_v16, %v27_v4 }
 0x13f   :  { %v37_v19 = vsub.f32 %v36_v18, %v24_v17 }
 0x141   :  { %v46_v20 = vsel %vm45_vm2, %v37_v19, 0.0 }
 0x142   :  { %47 = vadd.xlane.f32.xlu1 %v46_v20 }
 0x1cf   :  { %v48_v21 = vpop.xlane.xlu1 %47 }
 0x1d0   :  { %v49_v22 = vrot.slane %v48_v21, 4 }
 0x1d2   :  { %v50_v23 = vadd.f32 %v49_v22, %v48_v21 }
 0x1d4   :  { %v51_v24 = vrot.slane %v50_v23, 2 }
 0x1d6   :  { %v52_v25 = vadd.f32 %v51_v24, %v50_v23 }
 0x1d8   :  { %v53_v26 = vrot.slane %v52_v25, 1 }
 0x1da   :  { %v54_v27 = vadd.f32 %v53_v26, %v52_v25 }
 0x1dc   :  { %72 = vpush %v54_v27 }
 0x20d   :  { %s73_s13 = spop %72 }
 0x20e   :  { %v56_v28 = vstv %s73_s13 }
 0x20f   :  { %57 = vst [vmem:[#allocation2] sm:$0xff] %v56_v28 }
 0x210   :  { %92 = shalt.err (!%p89_p4)
}
 0x211   :  { %s93_s17 = scalar_lea.hbm %s145_s2, 128 }
 0x212   :  { %p94_p5 = scmp.ne.s32.totalorder %s145_s2, %s93_s17  ;;  %p97_p6 = scmp.lt.u32.totalorder %s93_s17, %s145_s2 }
 0x214   :  { %p99_p7 = pnand %p97_p6, %p94_p5 }
 0x216   :  { %102 = shalt.err (!%p99_p7)
}
 0x217   :  { %67 = dma.vmem_to_hbm [thread:$0]  %s65_s1, 128, %s145_s2, [#allocation3]  }
 0x218   :  { %103 = dma.done.wait [#allocation3], 128  }
 0x219   :  { %104 = vsyncadd [#allocation3], 4294967168 }
 0x21a   :  { %71 = vsyncpa [#allocation3], 1 }

</bundles_post_ra>
